<compile_context>
chip_gen: v6e
topology: v6e:2x2x1
jax: 0.10.0
libtpu: 0.0.40
codegen_flags: <defaults>
</compile_context>

<pallas_src>
import jax
import jax.numpy as jnp
from jax.experimental import pallas as pl
from jax.experimental.pallas import tpu as pltpu


def _round_up(x, m):
    return ((x + m - 1) // m) * m


def _gaussianize_kernel(x1_ref, x2_ref, w_ref, b_ref, z2_ref, logdet_ref):
    dp = z2_ref.shape[-1]
    # Single fused matmul: h = x1 @ [Wm_s | Wl_s] + [bm_s | bl_s]
    h = jnp.dot(x1_ref[...], w_ref[...],
                preferred_element_type=jnp.float32) + b_ref[...]
    m = h[:, :dp]          # lane-tile-aligned split (dp % 128 == 0)
    logs = h[:, dp:]
    z2_ref[...] = (x2_ref[...] - m) * jnp.exp(-logs)
    # Lane-dense logdet: (1, tb) row via a ones-vector contraction on the MXU
    # (contract last dims of both operands, i.e. ones @ logs.T).
    ones = jnp.ones((1, dp), dtype=jnp.float32)
    ld = jax.lax.dot_general(
        ones, logs,
        dimension_numbers=(((1,), (1,)), ((), ())),
        preferred_element_type=jnp.float32)          # (1, tb)
    logdet_ref[...] = -ld


def _gaussianize_2d(x1, x2, weight, bias, log_scale_factor, *, tb_max=256):
    """x1, x2: [B, D] (f32).  weight: [2D, D], bias / log_scale_factor: [2D]."""
    B, D = x1.shape

    # --- one-time glue: de-interleave + fold exp(log_scale_factor) into W, b ---
    scale = jnp.exp(log_scale_factor)
    wm = weight[0::2, :].T * scale[0::2][None, :]     # [D, D]
    wl = weight[1::2, :].T * scale[1::2][None, :]     # [D, D]
    bm = bias[0::2] * scale[0::2]                     # [D]
    bl = bias[1::2] * scale[1::2]                     # [D]

    # --- padding: feature dim -> multiple of 128, batch -> multiple of tile ---
    Dp = _round_up(D, 128)
    B8 = _round_up(B, 8)
    if B8 <= tb_max:
        tb, Bp = B8, B8
    else:
        tb = _round_up(tb_max, 128)                   # keep tb a lane multiple
        Bp = _round_up(B, tb)
    nb = Bp // tb

    w_cat = jnp.zeros((Dp, 2 * Dp), jnp.float32)
    w_cat = w_cat.at[:D, :D].set(wm).at[:D, Dp:Dp + D].set(wl)
    b_cat = jnp.zeros((1, 2 * Dp), jnp.float32)
    b_cat = b_cat.at[0, :D].set(bm).at[0, Dp:Dp + D].set(bl)

    x1p = jnp.zeros((Bp, Dp), jnp.float32).at[:B, :D].set(x1)
    x2p = jnp.zeros((Bp, Dp), jnp.float32).at[:B, :D].set(x2)

    # --- VMEM budget (double-buffered tiles + single weight slab), capped for v7x ---
    vmem_bytes = 4 * (2 * 3 * tb * Dp          # x1, x2, z2 (double-buffered)
                      + 2 * Dp * 2 * Dp        # fused weights
                      + 2 * 2 * Dp             # bias
                      + 2 * tb                 # logdet row
                      + 2 * tb * 2 * Dp)       # h intermediate / headroom
    vmem_limit = min(max(int(1.5 * vmem_bytes) + (2 << 20), 32 << 20), 64 << 20)

    cost = pl.CostEstimate(
        flops=2 * Bp * Dp * (2 * Dp) + 2 * Bp * Dp + 4 * Bp * Dp,
        transcendentals=Bp * Dp,
        bytes_accessed=4 * (3 * Bp * Dp + 2 * Dp * Dp + 2 * Dp + Bp),
    )

    z2p, logdet2d = pl.pallas_call(
        _gaussianize_kernel,
        out_shape=(jax.ShapeDtypeStruct((Bp, Dp), jnp.float32),
                   jax.ShapeDtypeStruct((1, Bp), jnp.float32)),
        grid_spec=pltpu.PrefetchScalarGridSpec(
            num_scalar_prefetch=0,
            grid=(nb,),
            in_specs=[
                pl.BlockSpec((tb, Dp), lambda i: (i, 0)),       # x1 tile
                pl.BlockSpec((tb, Dp), lambda i: (i, 0)),       # x2 tile
                pl.BlockSpec((Dp, 2 * Dp), lambda i: (0, 0)),   # fused weights (const)
                pl.BlockSpec((1, 2 * Dp), lambda i: (0, 0)),    # fused bias   (const)
            ],
            out_specs=[
                pl.BlockSpec((tb, Dp), lambda i: (i, 0)),       # z2 tile
                pl.BlockSpec((1, tb), lambda i: (0, i)),        # logdet (lane-dense)
            ],
        ),
        compiler_params=pltpu.CompilerParams(
            dimension_semantics=("parallel",),
            vmem_limit_bytes=vmem_limit),
        cost_estimate=cost,
    )(x1p, x2p, w_cat, b_cat)

    return z2p[:B, :D], logdet2d[0, :B]


def gaussianize_forward(x1, x2, weight, bias, log_scale_factor, *, tb_max=256):
    """Forward pass of Gaussianize.

    x1, x2: [B, D] or [B, S, D].  weight: [2D, D], bias / log_scale_factor: [2D].
    Returns (z2, logdet) with z2 shaped like x2 and logdet over all leading dims.
    """
    x1 = jnp.asarray(x1, jnp.float32)
    x2 = jnp.asarray(x2, jnp.float32)
    weight = jnp.asarray(weight, jnp.float32)
    bias = jnp.asarray(bias, jnp.float32)
    log_scale_factor = jnp.asarray(log_scale_factor, jnp.float32)

    lead = x1.shape[:-1]
    D = x1.shape[-1]
    assert x2.shape == x1.shape
    assert weight.shape == (2 * D, D)

    x1f = x1.reshape(-1, D)
    x2f = x2.reshape(-1, D)
    z2f, logdetf = _gaussianize_2d(x1f, x2f, weight, bias, log_scale_factor,
                                   tb_max=tb_max)
    return z2f.reshape(*lead, D), logdetf.reshape(*lead)


def _reference(x1, x2, weight, bias, log_scale_factor):
    h = x1 @ weight.T + bias
    h = h * jnp.exp(log_scale_factor)
    m, logs = h[..., 0::2], h[..., 1::2]
    z2 = (x2 - m) * jnp.exp(-logs)
    logdet = -logs.sum(-1)
    return z2, logdet


if __name__ == "__main__":
    B, D = 8, 32            # batch, dim  (Linear: D -> 2D)
    key = jax.random.PRNGKey(0)
    k1, k2, k3, k4, k5 = jax.random.split(key, 5)

    x1 = jax.random.normal(k1, (B, D), dtype=jnp.float32)
    x2 = jax.random.normal(k2, (B, D), dtype=jnp.float32)

    # Module __init__ zero-inits these; use small deterministic non-zero values
    # so the test exercises the full compute path.
    weight = 0.05 * jax.random.normal(k3, (2 * D, D), dtype=jnp.float32)
    bias = 0.05 * jax.random.normal(k4, (2 * D,), dtype=jnp.float32)
    log_scale_factor = 0.1 * jax.random.normal(k5, (2 * D,), dtype=jnp.float32)

    # 2-D path
    z2, logdet = gaussianize_forward(x1, x2, weight, bias, log_scale_factor)
    jax.block_until_ready((z2, logdet))
    z2_ref, logdet_ref = _reference(x1, x2, weight, bias, log_scale_factor)
    assert z2.shape == (B, D) and logdet.shape == (B,)
    assert jnp.allclose(z2, z2_ref, atol=1e-5, rtol=1e-5), "z2 mismatch"
    assert jnp.allclose(logdet, logdet_ref, atol=1e-5, rtol=1e-5), "logdet mismatch"

    # 3-D path (matches the module's len(h.shape) == 3 branch)
    S = 4
    x1_3 = x1.reshape(2, S, D)
    x2_3 = x2.reshape(2, S, D)
    z2_3, logdet_3 = gaussianize_forward(x1_3, x2_3, weight, bias,
                                         log_scale_factor)
    jax.block_until_ready((z2_3, logdet_3))
    assert z2_3.shape == (2, S, D) and logdet_3.shape == (2, S)
    assert jnp.allclose(z2_3, z2_ref.reshape(2, S, D), atol=1e-5, rtol=1e-5)
    assert jnp.allclose(logdet_3, logdet_ref.reshape(2, S), atol=1e-5, rtol=1e-5)

    print("KERNEL_OK")
</pallas_src>

<mosaic_0001>
module attributes {stable_mosaic.version = 11 : i64} {
  func.func @_gaussianize_kernel(%arg0: i32, %arg1: memref<8x128xf32, #tpu.memory_space<vmem>>, %arg2: memref<8x128xf32, #tpu.memory_space<vmem>>, %arg3: memref<128x256xf32, #tpu.memory_space<vmem>>, %arg4: memref<1x256xf32, #tpu.memory_space<vmem>>, %arg5: memref<8x128xf32, #tpu.memory_space<vmem>>, %arg6: memref<1x8xf32, #tpu.memory_space<vmem>>) attributes {dimension_semantics = [#tpu.dimension_semantics<parallel>], iteration_bounds = array<i64: 1>, scalar_prefetch = 0 : i64, scratch_operands = 0 : i64, tpu.core_type = #tpu.core_type<tc>, window_params = [{transform_indices = @transform_0, window_bounds = array<i64: 8, 128>}, {transform_indices = @transform_1, window_bounds = array<i64: 8, 128>}, {pipeline_mode = #tpu.pipeline_mode<synchronous>, transform_indices = @transform_2, window_bounds = array<i64: 128, 256>}, {pipeline_mode = #tpu.pipeline_mode<synchronous>, transform_indices = @transform_3, window_bounds = array<i64: 1, 256>}, {transform_indices = @transform_4, window_bounds = array<i64: 8, 128>}, {transform_indices = @transform_5, window_bounds = array<i64: 1, 8>}]} {
    %c0 = arith.constant 0 : index
    %c0_0 = arith.constant 0 : index
    %0 = vector.load %arg1[%c0, %c0_0] : memref<8x128xf32, #tpu.memory_space<vmem>>, vector<8x128xf32>
    %c0_1 = arith.constant 0 : index
    %c0_2 = arith.constant 0 : index
    %1 = vector.load %arg3[%c0_1, %c0_2] : memref<128x256xf32, #tpu.memory_space<vmem>>, vector<128x256xf32>
    %cst = arith.constant dense<0.000000e+00> : vector<8x256xf32>
    %2 = tpu.matmul %0, %1, %cst {dimension_numbers = #tpu.dot_dimension_numbers<[1], [0], [0], [1], [0, 0, 1, 1], [], []>} : vector<8x128xf32>, vector<128x256xf32>, vector<8x256xf32> -> vector<8x256xf32>
    %c0_3 = arith.constant 0 : index
    %c0_4 = arith.constant 0 : index
    %3 = vector.load %arg4[%c0_3, %c0_4] : memref<1x256xf32, #tpu.memory_space<vmem>>, vector<1x256xf32>
    %4 = vector.broadcast %3 : vector<1x256xf32> to vector<8x256xf32>
    %5 = arith.addf %2, %4 : vector<8x256xf32>
    %6 = vector.extract_strided_slice %5 {offsets = [0, 0], sizes = [8, 128], strides = [1, 1]} : vector<8x256xf32> to vector<8x128xf32>
    %7 = vector.extract_strided_slice %5 {offsets = [0, 128], sizes = [8, 128], strides = [1, 1]} : vector<8x256xf32> to vector<8x128xf32>
    %c0_5 = arith.constant 0 : index
    %c0_6 = arith.constant 0 : index
    %8 = vector.load %arg2[%c0_5, %c0_6] : memref<8x128xf32, #tpu.memory_space<vmem>>, vector<8x128xf32>
    %9 = arith.subf %8, %6 : vector<8x128xf32>
    %cst_7 = arith.constant 0.000000e+00 : f32
    %10 = vector.broadcast %cst_7 : f32 to vector<8x128xf32>
    %11 = arith.subf %10, %7 : vector<8x128xf32>
    %12 = math.exp %11 : vector<8x128xf32>
    %13 = arith.mulf %9, %12 : vector<8x128xf32>
    %c0_8 = arith.constant 0 : index
    %c0_9 = arith.constant 0 : index
    %14 = vector.load %arg5[%c0_8, %c0_9] : memref<8x128xf32, #tpu.memory_space<vmem>>, vector<8x128xf32>
    tpu.vector_store %arg5[%c0_8, %c0_9], %13 {strides = array<i32>} : memref<8x128xf32, #tpu.memory_space<vmem>>, vector<8x128xf32>,
    %cst_10 = arith.constant 1.000000e+00 : f32
    %15 = vector.broadcast %cst_10 : f32 to vector<1x128xf32>
    %cst_11 = arith.constant dense<0.000000e+00> : vector<1x8xf32>
    %16 = tpu.matmul %15, %7, %cst_11 {dimension_numbers = #tpu.dot_dimension_numbers<[1], [1], [0], [0], [0, 0, 1, 0], [], []>} : vector<1x128xf32>, vector<8x128xf32>, vector<1x8xf32> -> vector<1x8xf32>
    %cst_12 = arith.constant 0.000000e+00 : f32
    %17 = vector.broadcast %cst_12 : f32 to vector<1x8xf32>
    %18 = arith.subf %17, %16 : vector<1x8xf32>
    %c0_13 = arith.constant 0 : index
    %c0_14 = arith.constant 0 : index
    %19 = vector.load %arg6[%c0_13, %c0_14] : memref<1x8xf32, #tpu.memory_space<vmem>>, vector<1x8xf32>
    tpu.vector_store %arg6[%c0_13, %c0_14], %18 {strides = array<i32>} : memref<1x8xf32, #tpu.memory_space<vmem>>, vector<1x8xf32>,
    return
  }
  func.func @transform_0(%arg0: i32) -> (i32, i32) {
    %c0_i32 = arith.constant 0 : i32
    %c0_i32_0 = arith.constant 0 : i32
    return %arg0, %c0_i32 : i32, i32
  }
  func.func @transform_1(%arg0: i32) -> (i32, i32) {
    %c0_i32 = arith.constant 0 : i32
    %c0_i32_0 = arith.constant 0 : i32
    return %arg0, %c0_i32 : i32, i32
  }
  func.func @transform_2(%arg0: i32) -> (i32, i32) {
    %c0_i32 = arith.constant 0 : i32
    %c0_i32_0 = arith.constant 0 : i32
    %c0_i32_1 = arith.constant 0 : i32
    return %c0_i32, %c0_i32_0 : i32, i32
  }
  func.func @transform_3(%arg0: i32) -> (i32, i32) {
    %c0_i32 = arith.constant 0 : i32
    %c0_i32_0 = arith.constant 0 : i32
    %c0_i32_1 = arith.constant 0 : i32
    return %c0_i32, %c0_i32_0 : i32, i32
  }
  func.func @transform_4(%arg0: i32) -> (i32, i32) {
    %c0_i32 = arith.constant 0 : i32
    %c0_i32_0 = arith.constant 0 : i32
    return %arg0, %c0_i32 : i32, i32
  }
  func.func @transform_5(%arg0: i32) -> (i32, i32) {
    %c0_i32 = arith.constant 0 : i32
    %c0_i32_0 = arith.constant 0 : i32
    return %c0_i32, %arg0 : i32, i32
  }
}

</mosaic_0001>

<bundles_post_ra>
// kernel: tpu_custom_call.1
= control target key start
LH: loop header
LB: loop body
LE: loop exit
PB: predicated region body
PF: predicated region fallthrough
CT: control target
= control target key end

     0   :  { %11 = vsyncpa [#allocation3], 0  ;;  %s472_s0 = inlined_call_operand.hbm [shape: f32[8,128], index: 0, kind: input, shape index: {}]   ;;  %s473_s1 = inlined_call_operand.hbm [shape: f32[8,128], index: 1, kind: input, shape index: {}]   ;;  %s474_s2 = inlined_call_operand.hbm [shape: f32[128,256], index: 2, kind: input, shape index: {}]   ;;  %s475_s3 = inlined_call_operand.vmem [shape: f32[1,256], index: 3, kind: input, shape index: {}]   ;;  %s476_s4 = inlined_call_operand.hbm [shape: f32[8,128], index: 4, kind: output, shape index: {0}]   ;;  %s477_s5 = inlined_call_operand.hbm [shape: f32[1,8], index: 5, kind: output, shape index: {1}]  }
   0x1   :  { %12 = vsyncpa [#allocation6], 0 }
   0x2   :  { %13 = vsyncpa [#allocation4], 0 }
   0x3   :  { %14 = vsyncpa [#allocation10], 0  ;;  %s411_s18 = smov [#allocation5]   ;;  %s412_s20 = smov [#allocation2]  }
   0x4   :  { %s31_s19 = sshll.u32 %s411_s18, 4  ;;  %s21_s21 = sshll.u32 %s412_s20, 4  ;;  %s32_s19 = int_to_ptr.vmem [resolvable:$true] %s31_s19  ;;  %s22_s21 = int_to_ptr.vmem [resolvable:$true] %s21_s21 }
   0x5   :  { %s311_s22 = scalar_lea.vmem %s32_s19, 128  ;;  %p316_p1 = scmp.lt.s32.totalorder %s32_s19, %s32_s19 }
   0x6   :  { %p312_p0 = scmp.ne.s32.totalorder %s32_s19, %s311_s22  ;;  %p317_p2 = scmp.lt.s32.totalorder %s311_s22, %s311_s22 }
   0x8   :  { %p318_p3 = por %p317_p2, %p316_p1 }
   0xa   :  { %p319_p4 = pnand %p318_p3, %p312_p0 }
   0xc   :  { %322 = shalt.err (!%p319_p4)
}
   0xd   :  { %34 = dma.hbm_to_vmem [thread:$0]  %s473_s1, 128, %s32_s19, [#allocation6]  }
   0xe   :  { %s331_s25 = scalar_lea.vmem %s22_s21, 128  ;;  %p336_p6 = scmp.lt.s32.totalorder %s22_s21, %s22_s21 }
   0xf   :  { %p332_p5 = scmp.ne.s32.totalorder %s22_s21, %s331_s25  ;;  %p337_p7 = scmp.lt.s32.totalorder %s331_s25, %s331_s25 }
  0x11   :  { %p338_p8 = por %p337_p7, %p336_p6 }
  0x13   :  { %p339_p9 = pnand %p338_p8, %p332_p5 }
  0x15   :  { %342 = shalt.err (!%p339_p9)
}
  0x16   :  { %24 = dma.hbm_to_vmem [thread:$0]  %s472_s0, 128, %s22_s21, [#allocation3]  }
  0x17   :  { %s413_s28 = smov [#allocation7]  }
  0x18   :  { %s40_s29 = sshll.u32 %s413_s28, 4  ;;  %s41_s29 = int_to_ptr.vmem [resolvable:$true] %s40_s29 }
  0x19   :  { %s351_s30 = scalar_lea.vmem %s41_s29, 4096  ;;  %p356_p11 = scmp.lt.s32.totalorder %s41_s29, %s41_s29 }
  0x1a   :  { %p352_p10 = scmp.ne.s32.totalorder %s41_s29, %s351_s30  ;;  %p357_p12 = scmp.lt.s32.totalorder %s351_s30, %s351_s30 }
  0x1c   :  { %p358_p13 = por %p357_p12, %p356_p11 }
  0x1e   :  { %p359_p0 = pnand %p358_p13, %p352_p10 }
  0x20   :  { %362 = shalt.err (!%p359_p0)
}
  0x21   :  { %s414_s1 = smov 256   ;;  %s415_s6 = smov 16  }
  0x22   :  { %46 = dma.hbm_to_vmem [thread:$0]  %s474_s2, 4096, %s41_s29, [#allocation6], %s414_s1, %s414_s1, %s415_s6  }
  0x23   :  { %403 = dma.done.wait [#allocation3], 128  }
  0x24   :  { %404 = vsyncadd [#allocation3], 4294967168 }
  0x25   :  { %405 = dma.done.wait [#allocation6], 4224  }
  0x26   :  { %406 = vsyncadd [#allocation6], 4294963072  ;;  %v416_v0 = vmov 0.0   ;;  %v90_v1 = vld [vmem:[#allocation7 + $0xf8] sm:$0xff]  ;;  %v89_v2 = vld [vmem:[#allocation7 + $0xf0] sm:$0xff]  ;;  %vm417_vm0 = vmmov 0   ;;  %v93_v34 = vlaneseq }
  0x27   :  { %167 = vmatprep.mubr.f32.mxu0 %v416_v0  ;;  %286 = vmatprep.subr.mxu1 %v416_v0  ;;  %v88_v3 = vld [vmem:[#allocation7 + $0xe8] sm:$0xff]  ;;  %v87_v4 = vld [vmem:[#allocation7 + $0xe0] sm:$0xff]  ;;  %v86_v5 = vld [vmem:[#allocation7 + $0xd8] sm:$0xff]  ;;  %v418_v44 = vmov 1.0   ;;  %s419_s9 = smov [#allocation8]  }
  0x28   :  { %103 = vmatprep.subr.mxu0 %v90_v1  ;;  %v85_v6 = vld [vmem:[#allocation7 + $0xd0] sm:$0xff]  ;;  %v84_v7 = vld [vmem:[#allocation7 + $0xc8] sm:$0xff]  ;;  %v83_v8 = vld [vmem:[#allocation7 + $0xc0] sm:$0xff]  ;;  %288 = vmatprep.mubr.msk.f32.mxu1 %vm417_vm0, %v416_v0  ;;  %v94_v35 = vshrl.u32 %v93_v34, 7 }
  0x29   :  { %104 = vmatpush1.msra.mxu0 %v89_v2  ;;  %v82_v9 = vld [vmem:[#allocation7 + $0xb8] sm:$0xff]  ;;  %v81_v10 = vld [vmem:[#allocation7 + $0xb0] sm:$0xff]  ;;  %v80_v11 = vld [vmem:[#allocation7 + $0xa8] sm:$0xff] }
  0x2a   :  { %105 = vmatprep.subr.mxu0 %v88_v3  ;;  %v79_v12 = vld [vmem:[#allocation7 + $0xa0] sm:$0xff]  ;;  %v78_v13 = vld [vmem:[#allocation7 + $0x98] sm:$0xff]  ;;  %v77_v14 = vld [vmem:[#allocation7 + $0x90] sm:$0xff]  ;;  %v99_v36 = vsub.s32 1, %v94_v35  ;;  %v95_v45 = vsub.s32 0, %v94_v35 }
  0x2b   :  { %106 = vmatpush1.msra.mxu0 %v87_v4  ;;  %v76_v15 = vld [vmem:[#allocation7 + $0x88] sm:$0xff]  ;;  %v75_v16 = vld [vmem:[#allocation7 + $0x80] sm:$0xff]  ;;  %v74_v17 = vld [vmem:[#allocation7 + $0x78] sm:$0xff] }
  0x2c   :  { %107 = vmatprep.subr.mxu0 %v86_v5  ;;  %v73_v18 = vld [vmem:[#allocation7 + $0x70] sm:$0xff]  ;;  %v72_v19 = vld [vmem:[#allocation7 + $0x68] sm:$0xff]  ;;  %v71_v20 = vld [vmem:[#allocation7 + $0x60] sm:$0xff] }
  0x2d   :  { %108 = vmatpush1.msra.mxu0 %v85_v6  ;;  %v70_v21 = vld [vmem:[#allocation7 + $0x58] sm:$0xff]  ;;  %v69_v22 = vld [vmem:[#allocation7 + $0x50] sm:$0xff]  ;;  %v68_v23 = vld [vmem:[#allocation7 + $0x48] sm:$0xff] }
  0x2e   :  { %109 = vmatprep.subr.mxu0 %v84_v7  ;;  %v67_v24 = vld [vmem:[#allocation7 + $0x40] sm:$0xff]  ;;  %v66_v25 = vld [vmem:[#allocation7 + $0x38] sm:$0xff]  ;;  %v65_v26 = vld [vmem:[#allocation7 + $0x30] sm:$0xff] }
  0x2f   :  { %110 = vmatpush1.msra.mxu0 %v83_v8  ;;  %v64_v27 = vld [vmem:[#allocation7 + $0x28] sm:$0xff]  ;;  %v63_v28 = vld [vmem:[#allocation7 + $0x20] sm:$0xff]  ;;  %v62_v29 = vld [vmem:[#allocation7 + $0x18] sm:$0xff] }
  0x30   :  { %111 = vmatprep.subr.mxu0 %v82_v9  ;;  %v61_v30 = vld [vmem:[#allocation7 + $0x10] sm:$0xff]  ;;  %v60_v31 = vld [vmem:[#allocation7 + $0x8] sm:$0xff]  ;;  %v59_v32 = vld [vmem:[#allocation7] sm:$0xff] }
  0x31   :  { %112 = vmatpush1.msra.mxu0 %v81_v10  ;;  %v58_v33 = vld [vmem:[#allocation2] sm:$0xff]  ;;  %v174_v48 = vld [vmem:[#allocation5] sm:$0xff] }
  0x32   :  { %113 = vmatprep.subr.mxu0 %v80_v11  ;;  %v91_v37 = vld [vmem:[%s475_s3] sm:$0x3]  ;;  %s260_s3 = sshll.u32 %s419_s9, 4  ;;  %s261_s3 = int_to_ptr.vmem [resolvable:$true] %s260_s3 }
  0x33   :  { %114 = vmatpush1.msra.mxu0 %v79_v12  ;;  %v100_v38 = vrot.slane %v91_v37, %v99_v36  ;;  %v96_v46 = vrot.slane %v91_v37, %v95_v45  ;;  %s363_s10 = scalar_lea.vmem %s261_s3, 128  ;;  %p368_p2 = scmp.lt.s32.totalorder %s261_s3, %s261_s3 }
  0x34   :  { %115 = vmatprep.subr.mxu0 %v78_v13  ;;  %p364_p1 = scmp.ne.s32.totalorder %s261_s3, %s363_s10  ;;  %p369_p3 = scmp.lt.s32.totalorder %s363_s10, %s363_s10 }
  0x35   :  { %116 = vmatpush1.msra.mxu0 %v77_v14 }
  0x36   :  { %117 = vmatprep.subr.mxu0 %v76_v15  ;;  %p370_p4 = por %p369_p3, %p368_p2 }
  0x37   :  { %118 = vmatpush1.msra.mxu0 %v75_v16 }
  0x38   :  { %119 = vmatprep.subr.mxu0 %v74_v17  ;;  %p371_p5 = pnand %p370_p4, %p364_p1 }
  0x39   :  { %120 = vmatpush1.msra.mxu0 %v73_v18 }
  0x3a   :  { %121 = vmatprep.subr.mxu0 %v72_v19 }
  0x3b   :  { %122 = vmatpush1.msra.mxu0 %v71_v20 }
  0x3c   :  { %123 = vmatprep.subr.mxu0 %v70_v21 }
  0x3d   :  { %124 = vmatpush1.msra.mxu0 %v69_v22 }
  0x3e   :  { %125 = vmatprep.subr.mxu0 %v68_v23 }
  0x3f   :  { %126 = vmatpush1.msra.mxu0 %v67_v24 }
  0x40   :  { %127 = vmatprep.subr.mxu0 %v66_v25 }
  0x41   :  { %128 = vmatpush1.msra.mxu0 %v65_v26 }
  0x42   :  { %129 = vmatprep.subr.mxu0 %v64_v27 }
  0x43   :  { %130 = vmatpush1.msra.mxu0 %v63_v28 }
  0x44   :  { %131 = vmatprep.subr.mxu0 %v62_v29 }
  0x45   :  { %132 = vmatpush1.msra.mxu0 %v61_v30 }
  0x46   :  { %133 = vmatprep.subr.mxu0 %v60_v31 }
  0x47   :  { %134 = vmatpush1.msra.mxu0 %v59_v32 }
  0x48   :  { %168 = vmatmul.mubr.f32.vlgmr.msra.gmra.mxu0 %v58_v33 }
 0x108   :  { %v169_v39 = vpop.f32.mrf.mxu0 }
 0x109   :  { %v170_v47 = vadd.f32 %v169_v39, %v96_v46 }
 0x10a   :  { %v171_v40 = vpop.f32.mrf.mxu0 }
 0x10b   :  { %v172_v41 = vadd.f32 %v171_v40, %v100_v38  ;;  %v175_v49 = vsub.f32 %v174_v48, %v170_v47 }
 0x10d   :  { %v176_v42 = vsub.f32 0.0, %v172_v41  ;;  %287 = vmatpush3.xpose.msra.mxu1 %v172_v41 }
 0x10f   :  { %v177_v43 = vmul.f32 1.442695, %v176_v42 }
 0x110   :  { %289 = vmatmul.mubr.f32.vlgmr.msra.gmra.mxu1 %v418_v44 }
 0x111   :  { %301 = vpow2.f32 %v177_v43 }
 0x11e   :  { %v302_v50 = vpop.eup %301 }
 0x11f   :  { %v179_v51 = vmul.f32 %v302_v50, %v175_v49 }
 0x121   :  { %180 = vst [vmem:[#allocation8] sm:$0xff] %v179_v51 }
 0x122   :  { %374 = shalt.err (!%p371_p5)
}
 0x123   :  { %263 = dma.vmem_to_hbm [thread:$0]  %s261_s3, 128, %s476_s4, [#allocation4]   ;;  %vm252_vm1 = vcmask 57344  }
 0x124   :  { %s420_s13 = smov [#allocation9]  }
 0x125   :  { %s270_s14 = sshll.u32 %s420_s13, 4  ;;  %s271_s14 = int_to_ptr.vmem [resolvable:$true] %s270_s14 }
 0x126   :  { %s383_s15 = scalar_lea.vmem %s271_s14, 16  ;;  %s387_s16 = scalar_lea.vmem %s271_s14, 32 }
 0x127   :  { %p384_p6 = scmp.ne.s32.totalorder %s271_s14, %s383_s15  ;;  %p388_p7 = scmp.lt.s32.totalorder %s271_s14, %s271_s14 }
 0x128   :  { %p389_p8 = scmp.lt.s32.totalorder %s387_s16, %s383_s15 }
 0x12a   :  { %p390_p9 = por %p389_p8, %p388_p7 }
 0x12c   :  { %p391_p10 = pnand %p390_p9, %p384_p6 }
 0x1d0   :  { %v247_v52 = vpop.f32.mrf.mxu1 }
 0x1d1   :  { %v251_v53 = vsub.f32 0.0, %v247_v52 }
 0x1d2   :  { %v290_v54 = vpop.f32.mrf.mxu1 }
 0x1d3   :  { %253 = vst.msk [vmem:[#allocation9] sm:$0x1] %vm252_vm1, %v251_v53 }
 0x1d4   :  { %394 = shalt.err (!%p391_p10)
}
 0x1d5   :  { %273 = dma.vmem_to_hbm [thread:$0]  %s271_s14, 16, %s477_s5, [#allocation10]  }
 0x1d6   :  { %407 = dma.done.wait [#allocation4], 128  }
 0x1d7   :  { %408 = vsyncadd [#allocation4], 4294967168 }
 0x1d8   :  { %409 = dma.done.wait [#allocation10], 16  }
 0x1d9   :  { %410 = vsyncadd [#allocation10], 4294967280 }
 0x1da   :  { %280 = vsyncpa [#allocation3], 1 }
 0x1db   :  { %281 = vsyncpa [#allocation6], 1 }
 0x1dc   :  { %282 = vsyncpa [#allocation4], 1 }
 0x1dd   :  { %283 = vsyncpa [#allocation10], 1 }

</bundles_post_ra>
